<compile_context>
chip_gen: v5e
topology: v5e:2x2
jax: 0.10.0
libtpu: 0.0.40
codegen_flags: <defaults>
</compile_context>

<pallas_src>
import functools

import jax
import jax.numpy as jnp
import numpy as np
from jax import lax
from jax.experimental import pallas as pl
from jax.experimental.pallas import tpu as pltpu


# --------------------------------------------------------------------------
# VMEM-aware tile sizing.
# --------------------------------------------------------------------------
_F32_TEMPS = 6        # conservative count of compiler-internal f32 tile temps
_HEADROOM = 2 << 20   # params / semaphores / descriptors headroom


def _vmem_capacity_bytes():
    try:
        return int(pltpu.get_tpu_info().vmem_capacity_bytes)
    except Exception:
        return 64 * 1024 * 1024   # v7x per-TC size: a safe floor for all gens


def _sublane_align(dtype):
    # 8 rows for f32, 16 for bf16/f16, 32 for int8/fp8 (sublane packing).
    return max(8, 32 // jnp.dtype(dtype).itemsize)


def _per_row_bytes(c, x_dtype, out_dtype):
    xb = jnp.dtype(x_dtype).itemsize
    ob = jnp.dtype(out_dtype).itemsize
    # 2x double-buffered input + 2x double-buffered output + f32 temporaries.
    return max(c, 1) * (2 * xb + 2 * ob + _F32_TEMPS * 4)


def _tile_budget_bytes():
    # Per-generation budget: ~35% of per-TC VMEM, capped at 40 MiB so a v6e
    # budget never overshoots v7x's 64 MiB per-TC VMEM.
    return min(int(_vmem_capacity_bytes() * 0.35), 40 << 20)


def _pick_row_tile(n, c, x_dtype, out_dtype):
    tn = max(1, _tile_budget_bytes() // _per_row_bytes(c, x_dtype, out_dtype))
    if tn >= n:
        return n                      # single tile: block dim == full array dim
    align = _sublane_align(x_dtype)
    tn = max(align, (tn // align) * align)
    return int(min(tn, n))


def _vmem_limit_bytes(tn, c, x_dtype, out_dtype):
    need = tn * _per_row_bytes(c, x_dtype, out_dtype) + _HEADROOM
    cap = _vmem_capacity_bytes()
    return int(min(max(need, 16 << 20), int(cap * 0.9)))


# --------------------------------------------------------------------------
# Fused small-input training kernel: BN stats + LN stats + normalize, one pass.
# --------------------------------------------------------------------------
def _fused_small_kernel(sw_ref, x_ref, wb_ref, o_ref, mv_ref, *, eps, n, c):
    x = x_ref[...].astype(jnp.float32)                        # (N, C)
    x2 = x * x

    # Per-channel (BN) stats: cross-sublane reduction on the MXU.
    ones = jnp.ones((1, n), jnp.float32)
    s_bn = jnp.dot(ones, x, preferred_element_type=jnp.float32)    # (1, C)
    sq_bn = jnp.dot(ones, x2, preferred_element_type=jnp.float32)
    mean_bn = s_bn / n
    var_bn = jnp.maximum((sq_bn - n * mean_bn * mean_bn) / (n - 1), 0.0)

    # Per-row (LN) stats, single fused pass (unbiased, matches torch.var).
    s_ln = jnp.sum(x, axis=1, keepdims=True)                  # (N, 1)
    sq_ln = jnp.sum(x2, axis=1, keepdims=True)
    mean_ln = s_ln / c
    var_ln = jnp.maximum((sq_ln - c * mean_ln * mean_ln) / (c - 1), 0.0)

    mean = sw_ref[0] * mean_ln + sw_ref[1] * mean_bn
    var = sw_ref[2] * var_ln + sw_ref[3] * var_bn
    xn = (x - mean) * lax.rsqrt(var + eps)
    o_ref[...] = (xn * wb_ref[0:1, :] + wb_ref[1:2, :]).astype(o_ref.dtype)
    mv_ref[0:1, :] = mean_bn
    mv_ref[1:2, :] = var_bn


# --------------------------------------------------------------------------
# Phase 1 (tiled training path): per-channel sum / sum-of-squares partials.
# Accumulates directly into the (nsplit, 1, C) output blocks; leading
# "parallel" axis lets v7x's two TensorCores each own one partial row.
# --------------------------------------------------------------------------
def _bn_stats_kernel(x_ref, sum_ref, sq_ref, *, n, tn, tiles_per_core):
    p = pl.program_id(0)
    j = pl.program_id(1)
    bi = p * tiles_per_core + j          # global row-tile index

    @pl.when(j == 0)
    def _():
        sum_ref[...] = jnp.zeros_like(sum_ref)
        sq_ref[...] = jnp.zeros_like(sq_ref)

    ones = jnp.ones((1, tn), jnp.float32)

    def _accum(xt):
        # axis-0 (cross-sublane) reduction on the MXU via a ones-vector matmul.
        sum_ref[...] += jnp.dot(ones, xt,
                                preferred_element_type=jnp.float32
                                ).reshape(sum_ref.shape)
        sq_ref[...] += jnp.dot(ones, xt * xt,
                               preferred_element_type=jnp.float32
                               ).reshape(sq_ref.shape)

    # Hot path: full in-range tile, no masking ops at all.
    @pl.when((bi + 1) * tn <= n)
    def _():
        _accum(x_ref[...].astype(jnp.float32))

    if n % tn != 0:
        # Only the single partial tail tile pays for the mask; fully
        # out-of-range duplicate tiles (index_map clamps their DMA to the
        # last valid block) contribute nothing.
        @pl.when(jnp.logical_and(bi * tn < n, (bi + 1) * tn > n))
        def _():
            x = x_ref[...].astype(jnp.float32)
            row = bi * tn + lax.broadcasted_iota(jnp.int32, (tn, 1), 0)
            _accum(jnp.where(row < n, x, 0.0))


# --------------------------------------------------------------------------
# Phase 2: per-row LN stats + switchable mix + normalize + affine.
# p_ref rows: [gamma, beta, softmax_m[1]*mean_bn, softmax_v[1]*var_bn].
# sw_ref (SMEM): [softmax_m[0], softmax_v[0]].
# --------------------------------------------------------------------------
def _norm_kernel(sw_ref, x_ref, p_ref, o_ref, *, eps, c):
    # NOTE: on a partial last row tile, rows past N hold stale VMEM data;
    # their per-row stats are garbage, but the out-of-range writeback is
    # clipped so only in-range rows reach HBM (per-row math => no bleed).
    x = x_ref[...].astype(jnp.float32)                        # (tN, C)

    s = jnp.sum(x, axis=1, keepdims=True)                     # (tN, 1)
    sq = jnp.sum(x * x, axis=1, keepdims=True)
    mean_ln = s * (1.0 / c)
    var_ln = jnp.maximum((sq - c * mean_ln * mean_ln) / (c - 1), 0.0)

    mean = sw_ref[0] * mean_ln + p_ref[2:3, :]                # BN term pre-scaled
    var = sw_ref[1] * var_ln + p_ref[3:4, :]

    xn = (x - mean) * lax.rsqrt(var + eps)
    o_ref[...] = (xn * p_ref[0:1, :] + p_ref[1:2, :]).astype(o_ref.dtype)


# --------------------------------------------------------------------------
# Wrapper.
# --------------------------------------------------------------------------
def switch_norm_1d(x, weight, bias, mean_weight, var_weight,
                   running_mean, running_var, *, eps=1e-5, momentum=0.997,
                   using_moving_average=True, training=True,
                   _force_row_tile=None):
    """Returns (y, new_running_mean, new_running_var)."""
    n, c = x.shape
    # NOTE: unbiased divisors (C-1, N-1) mirror torch.var; N==1 / C==1 yields
    # inf/nan exactly like the PyTorch module would.
    mw = jax.nn.softmax(mean_weight.astype(jnp.float32))
    vw = jax.nn.softmax(var_weight.astype(jnp.float32))

    if _force_row_tile is None:
        tn = _pick_row_tile(n, c, x.dtype, x.dtype)
    else:
        tn = int(_force_row_tile)
    vmem_limit = _vmem_limit_bytes(tn, c, x.dtype, x.dtype)

    use_fused = training and (_force_row_tile is None) and (tn == n)

    if use_fused:
        # --- fused path: x fits the VMEM tile budget -> single kernel ------
        sw = jnp.concatenate([mw, vw])                        # (4,) f32 -> SMEM
        wb = jnp.concatenate([weight, bias], axis=0).astype(jnp.float32)
        out, mv = pl.pallas_call(
            functools.partial(_fused_small_kernel, eps=eps, n=n, c=c),
            grid_spec=pltpu.PrefetchScalarGridSpec(
                num_scalar_prefetch=1,
                grid=(1,),
                in_specs=[pl.BlockSpec((n, c), lambda i, sw: (0, 0)),
                          pl.BlockSpec((2, c), lambda i, sw: (0, 0))],
                out_specs=(pl.BlockSpec((n, c), lambda i, sw: (0, 0)),
                           pl.BlockSpec((2, c), lambda i, sw: (0, 0))),
            ),
            out_shape=(jax.ShapeDtypeStruct((n, c), x.dtype),
                       jax.ShapeDtypeStruct((2, c), jnp.float32)),
            compiler_params=pltpu.CompilerParams(
                dimension_semantics=("arbitrary",),
                vmem_limit_bytes=vmem_limit),
        )(sw, x, wb)
        mean_bn = mv[0:1, :]
        var_bn = mv[1:2, :]
    else:
        if training:
            # --- phase 1: per-channel BN stats, 2-way split reduction ------
            nt = -(-n // tn)
            nsplit = 2 if nt >= 2 else 1
            tpc = -(-nt // nsplit)
            psum, psq = pl.pallas_call(
                functools.partial(_bn_stats_kernel, n=n, tn=tn,
                                  tiles_per_core=tpc),
                grid_spec=pltpu.PrefetchScalarGridSpec(
                    num_scalar_prefetch=0,
                    grid=(nsplit, tpc),
                    in_specs=[pl.BlockSpec(
                        (tn, c),
                        lambda p, j: (jnp.minimum(p * tpc + j, nt - 1), 0))],
                    out_specs=(
                        pl.BlockSpec((1, 1, c), lambda p, j: (p, 0, 0)),
                        pl.BlockSpec((1, 1, c), lambda p, j: (p, 0, 0))),
                ),
                out_shape=(jax.ShapeDtypeStruct((nsplit, 1, c), jnp.float32),
                           jax.ShapeDtypeStruct((nsplit, 1, c), jnp.float32)),
                compiler_params=pltpu.CompilerParams(
                    dimension_semantics=("parallel", "arbitrary"),
                    vmem_limit_bytes=vmem_limit),
            )(x)
            s = jnp.sum(psum, axis=0)                         # (1, C)
            sq = jnp.sum(psq, axis=0)
            mean_bn = s / n
            var_bn = jnp.maximum((sq - n * mean_bn * mean_bn) / (n - 1), 0.0)
        else:
            mean_bn = running_mean.astype(jnp.float32)
            var_bn = running_var.astype(jnp.float32)

        # --- phase 2: normalize; row tiles independent -> "parallel" -------
        sw2 = jnp.stack([mw[0], vw[0]])                       # (2,) f32 -> SMEM
        params = jnp.concatenate(
            [weight.astype(jnp.float32), bias.astype(jnp.float32),
             mw[1] * mean_bn, vw[1] * var_bn], axis=0)        # (4, C) resident
        nt2 = -(-n // tn)
        out = pl.pallas_call(
            functools.partial(_norm_kernel, eps=eps, c=c),
            grid_spec=pltpu.PrefetchScalarGridSpec(
                num_scalar_prefetch=1,
                grid=(nt2,),
                in_specs=[pl.BlockSpec((tn, c), lambda i, sw: (i, 0)),
                          pl.BlockSpec((4, c), lambda i, sw: (0, 0))],
                out_specs=pl.BlockSpec((tn, c), lambda i, sw: (i, 0)),
            ),
            out_shape=jax.ShapeDtypeStruct((n, c), x.dtype),
            compiler_params=pltpu.CompilerParams(
                dimension_semantics=("parallel",),
                vmem_limit_bytes=vmem_limit),
        )(sw2, x, params)

    # Running-stat update (functional version of the in-place buffer mutation).
    if training:
        if using_moving_average:
            new_rm = momentum * running_mean + (1.0 - momentum) * mean_bn
            new_rv = momentum * running_var + (1.0 - momentum) * var_bn
        else:
            new_rm = running_mean + mean_bn
            new_rv = running_var + mean_bn ** 2 + var_bn
    else:
        new_rm, new_rv = running_mean, running_var
    return out, new_rm, new_rv


# --------------------------------------------------------------------------
# Pure-JAX references (mirror the torch forward).
# --------------------------------------------------------------------------
def _reference_train(x, weight, bias, mean_weight, var_weight, eps):
    n, c = x.shape
    mean_ln = jnp.mean(x, axis=1, keepdims=True)
    var_ln = jnp.sum((x - mean_ln) ** 2, axis=1, keepdims=True) / (c - 1)
    mean_bn = jnp.mean(x, axis=0, keepdims=True)
    var_bn = jnp.sum((x - mean_bn) ** 2, axis=0, keepdims=True) / (n - 1)
    mw = jax.nn.softmax(mean_weight)
    vw = jax.nn.softmax(var_weight)
    mean = mw[0] * mean_ln + mw[1] * mean_bn
    var = vw[0] * var_ln + vw[1] * var_bn
    return (x - mean) / jnp.sqrt(var + eps) * weight + bias, mean_bn, var_bn


def _reference_eval(x, weight, bias, mean_weight, var_weight, rm, rv, eps):
    c = x.shape[1]
    mean_ln = jnp.mean(x, axis=1, keepdims=True)
    var_ln = jnp.sum((x - mean_ln) ** 2, axis=1, keepdims=True) / (c - 1)
    mw = jax.nn.softmax(mean_weight)
    vw = jax.nn.softmax(var_weight)
    mean = mw[0] * mean_ln + mw[1] * rm
    var = vw[0] * var_ln + vw[1] * rv
    return (x - mean) / jnp.sqrt(var + eps) * weight + bias


if __name__ == "__main__":
    num_features = 32
    eps = 1e-5
    momentum = 0.997

    key = jax.random.PRNGKey(0)

    # Deterministic init matching SwitchNorm1d.__init__ / reset_parameters.
    weight = jnp.ones((1, num_features), dtype=jnp.float32)
    bias = jnp.zeros((1, num_features), dtype=jnp.float32)
    mean_weight = jnp.ones((2,), dtype=jnp.float32)
    var_weight = jnp.ones((2,), dtype=jnp.float32)
    running_mean = jnp.zeros((1, num_features), dtype=jnp.float32)
    running_var = jnp.zeros((1, num_features), dtype=jnp.float32)

    # ---- training, small batch -> fused single-kernel fast path ----
    batch = 8
    x = jax.random.normal(key, (batch, num_features), dtype=jnp.float32)
    y, new_rm, new_rv = switch_norm_1d(
        x, weight, bias, mean_weight, var_weight, running_mean, running_var,
        eps=eps, momentum=momentum, using_moving_average=True, training=True)
    y = jax.block_until_ready(y)
    new_rm = jax.block_until_ready(new_rm)
    new_rv = jax.block_until_ready(new_rv)

    y_ref, mbn_ref, vbn_ref = _reference_train(
        x, weight, bias, mean_weight, var_weight, eps)
    np.testing.assert_allclose(np.asarray(y), np.asarray(y_ref),
                               rtol=1e-5, atol=1e-5)
    np.testing.assert_allclose(np.asarray(new_rm),
                               np.asarray((1.0 - momentum) * mbn_ref),
                               rtol=1e-5, atol=1e-6)
    np.testing.assert_allclose(np.asarray(new_rv),
                               np.asarray((1.0 - momentum) * vbn_ref),
                               rtol=1e-5, atol=1e-6)

    # ---- eval mode (uses running stats, phase-2 kernel only) ----
    y_eval, _, _ = switch_norm_1d(
        x, weight, bias, mean_weight, var_weight, new_rm, new_rv,
        eps=eps, momentum=momentum, using_moving_average=True, training=False)
    y_eval = jax.block_until_ready(y_eval)
    y_eval_ref = _reference_eval(
        x, weight, bias, mean_weight, var_weight, new_rm, new_rv, eps)
    np.testing.assert_allclose(np.asarray(y_eval), np.asarray(y_eval_ref),
                               rtol=1e-5, atol=1e-5)

    # ---- training with a forced small row tile: exercises the tiled
    #      two-phase path (split BN reduction, partial tail-tile masking) ----
    batch2 = 40
    x2 = jax.random.normal(jax.random.PRNGKey(0), (batch2, num_features),
                           dtype=jnp.float32)
    y2, rm2, rv2 = switch_norm_1d(
        x2, weight, bias, mean_weight, var_weight, running_mean, running_var,
        eps=eps, momentum=momentum, using_moving_average=True, training=True,
        _force_row_tile=16)
    y2 = jax.block_until_ready(y2)
    rm2 = jax.block_until_ready(rm2)
    y2_ref, mbn2_ref, vbn2_ref = _reference_train(
        x2, weight, bias, mean_weight, var_weight, eps)
    np.testing.assert_allclose(np.asarray(y2), np.asarray(y2_ref),
                               rtol=1e-5, atol=1e-5)
    np.testing.assert_allclose(np.asarray(rm2),
                               np.asarray((1.0 - momentum) * mbn2_ref),
                               rtol=1e-5, atol=1e-6)

    print("KERNEL_OK")
</pallas_src>

<mosaic_0001>
module attributes {stable_mosaic.version = 11 : i64} {
  func.func @_fused_small_kernel(%arg0: i32, %arg1: memref<4xf32, #tpu.memory_space<smem>>, %arg2: memref<8x32xf32, #tpu.memory_space<vmem>>, %arg3: memref<2x32xf32, #tpu.memory_space<vmem>>, %arg4: memref<8x32xf32, #tpu.memory_space<vmem>>, %arg5: memref<2x32xf32, #tpu.memory_space<vmem>>) attributes {dimension_semantics = [#tpu.dimension_semantics<arbitrary>], iteration_bounds = array<i64: 1>, scalar_prefetch = 1 : i64, scratch_operands = 0 : i64, tpu.core_type = #tpu.core_type<tc>, window_params = [{pipeline_mode = #tpu.pipeline_mode<synchronous>, transform_indices = @transform_0, window_bounds = array<i64: 8, 32>}, {pipeline_mode = #tpu.pipeline_mode<synchronous>, transform_indices = @transform_1, window_bounds = array<i64: 2, 32>}, {pipeline_mode = #tpu.pipeline_mode<synchronous>, transform_indices = @transform_2, window_bounds = array<i64: 8, 32>}, {pipeline_mode = #tpu.pipeline_mode<synchronous>, transform_indices = @transform_3, window_bounds = array<i64: 2, 32>}]} {
    %c0 = arith.constant 0 : index
    %c0_0 = arith.constant 0 : index
    %0 = vector.load %arg2[%c0, %c0_0] : memref<8x32xf32, #tpu.memory_space<vmem>>, vector<8x32xf32>
    %1 = arith.mulf %0, %0 : vector<8x32xf32>
    %cst = arith.constant 1.000000e+00 : f32
    %2 = vector.broadcast %cst : f32 to vector<1x8xf32>
    %cst_1 = arith.constant dense<0.000000e+00> : vector<1x32xf32>
    %3 = tpu.matmul %2, %0, %cst_1 {dimension_numbers = #tpu.dot_dimension_numbers<[1], [0], [0], [1], [0, 0, 1, 1], [], []>} : vector<1x8xf32>, vector<8x32xf32>, vector<1x32xf32> -> vector<1x32xf32>
    %cst_2 = arith.constant dense<0.000000e+00> : vector<1x32xf32>
    %4 = tpu.matmul %2, %1, %cst_2 {dimension_numbers = #tpu.dot_dimension_numbers<[1], [0], [0], [1], [0, 0, 1, 1], [], []>} : vector<1x8xf32>, vector<8x32xf32>, vector<1x32xf32> -> vector<1x32xf32>
    %cst_3 = arith.constant 8.000000e+00 : f32
    %5 = vector.broadcast %cst_3 : f32 to vector<1x32xf32>
    %6 = arith.divf %3, %5 : vector<1x32xf32>
    %cst_4 = arith.constant 8.000000e+00 : f32
    %7 = vector.broadcast %cst_4 : f32 to vector<1x32xf32>
    %8 = arith.mulf %7, %6 : vector<1x32xf32>
    %9 = arith.mulf %8, %6 : vector<1x32xf32>
    %10 = arith.subf %4, %9 : vector<1x32xf32>
    %cst_5 = arith.constant 7.000000e+00 : f32
    %11 = vector.broadcast %cst_5 : f32 to vector<1x32xf32>
    %12 = arith.divf %10, %11 : vector<1x32xf32>
    %cst_6 = arith.constant 0.000000e+00 : f32
    %13 = vector.broadcast %cst_6 : f32 to vector<1x32xf32>
    %14 = arith.maximumf %12, %13 : vector<1x32xf32>
    %cst_7 = arith.constant dense<0.000000e+00> : vector<8xf32>
    %15 = vector.multi_reduction <add>, %0, %cst_7 [1] : vector<8x32xf32> to vector<8xf32>
    %16 = vector.shape_cast %15 : vector<8xf32> to vector<8x1xf32>
    %cst_8 = arith.constant dense<0.000000e+00> : vector<8xf32>
    %17 = vector.multi_reduction <add>, %1, %cst_8 [1] : vector<8x32xf32> to vector<8xf32>
    %18 = vector.shape_cast %17 : vector<8xf32> to vector<8x1xf32>
    %cst_9 = arith.constant 3.200000e+01 : f32
    %19 = vector.broadcast %cst_9 : f32 to vector<8x1xf32>
    %20 = arith.divf %16, %19 : vector<8x1xf32>
    %cst_10 = arith.constant 3.200000e+01 : f32
    %21 = vector.broadcast %cst_10 : f32 to vector<8x1xf32>
    %22 = arith.mulf %21, %20 : vector<8x1xf32>
    %23 = arith.mulf %22, %20 : vector<8x1xf32>
    %24 = arith.subf %18, %23 : vector<8x1xf32>
    %cst_11 = arith.constant 3.100000e+01 : f32
    %25 = vector.broadcast %cst_11 : f32 to vector<8x1xf32>
    %26 = arith.divf %24, %25 : vector<8x1xf32>
    %cst_12 = arith.constant 0.000000e+00 : f32
    %27 = vector.broadcast %cst_12 : f32 to vector<8x1xf32>
    %28 = arith.maximumf %26, %27 : vector<8x1xf32>
    %c0_13 = arith.constant 0 : index
    %29 = memref.load %arg1[%c0_13] : memref<4xf32, #tpu.memory_space<smem>>
    %30 = vector.broadcast %29 : f32 to vector<8x1xf32>
    %31 = arith.mulf %30, %20 : vector<8x1xf32>
    %c1 = arith.constant 1 : index
    %32 = memref.load %arg1[%c1] : memref<4xf32, #tpu.memory_space<smem>>
    %33 = vector.broadcast %32 : f32 to vector<1x32xf32>
    %34 = arith.mulf %33, %6 : vector<1x32xf32>
    %35 = vector.broadcast %31 : vector<8x1xf32> to vector<8x32xf32>
    %36 = vector.broadcast %34 : vector<1x32xf32> to vector<8x32xf32>
    %37 = arith.addf %35, %36 : vector<8x32xf32>
    %c2 = arith.constant 2 : index
    %38 = memref.load %arg1[%c2] : memref<4xf32, #tpu.memory_space<smem>>
    %39 = vector.broadcast %38 : f32 to vector<8x1xf32>
    %40 = arith.mulf %39, %28 : vector<8x1xf32>
    %c3 = arith.constant 3 : index
    %41 = memref.load %arg1[%c3] : memref<4xf32, #tpu.memory_space<smem>>
    %42 = vector.broadcast %41 : f32 to vector<1x32xf32>
    %43 = arith.mulf %42, %14 : vector<1x32xf32>
    %44 = vector.broadcast %40 : vector<8x1xf32> to vector<8x32xf32>
    %45 = vector.broadcast %43 : vector<1x32xf32> to vector<8x32xf32>
    %46 = arith.addf %44, %45 : vector<8x32xf32>
    %47 = arith.subf %0, %37 : vector<8x32xf32>
    %cst_14 = arith.constant 9.99999974E-6 : f32
    %48 = vector.broadcast %cst_14 : f32 to vector<8x32xf32>
    %49 = arith.addf %46, %48 : vector<8x32xf32>
    %50 = math.rsqrt %49 : vector<8x32xf32>
    %51 = arith.mulf %47, %50 : vector<8x32xf32>
    %c0_15 = arith.constant 0 : index
    %c0_16 = arith.constant 0 : index
    %52 = vector.load %arg3[%c0_15, %c0_16] : memref<2x32xf32, #tpu.memory_space<vmem>>, vector<1x32xf32>
    %53 = vector.broadcast %52 : vector<1x32xf32> to vector<8x32xf32>
    %54 = arith.mulf %51, %53 : vector<8x32xf32>
    %c1_17 = arith.constant 1 : index
    %c0_18 = arith.constant 0 : index
    %55 = vector.load %arg3[%c1_17, %c0_18] : memref<2x32xf32, #tpu.memory_space<vmem>>, vector<1x32xf32>
    %56 = vector.broadcast %55 : vector<1x32xf32> to vector<8x32xf32>
    %57 = arith.addf %54, %56 : vector<8x32xf32>
    %c0_19 = arith.constant 0 : index
    %c0_20 = arith.constant 0 : index
    %58 = vector.load %arg4[%c0_19, %c0_20] : memref<8x32xf32, #tpu.memory_space<vmem>>, vector<8x32xf32>
    tpu.vector_store %arg4[%c0_19, %c0_20], %57 {strides = array<i32>} : memref<8x32xf32, #tpu.memory_space<vmem>>, vector<8x32xf32>,
    %c0_21 = arith.constant 0 : index
    %c0_22 = arith.constant 0 : index
    %59 = vector.load %arg5[%c0_21, %c0_22] : memref<2x32xf32, #tpu.memory_space<vmem>>, vector<1x32xf32>
    tpu.vector_store %arg5[%c0_21, %c0_22], %6 {strides = array<i32>} : memref<2x32xf32, #tpu.memory_space<vmem>>, vector<1x32xf32>,
    %c1_23 = arith.constant 1 : index
    %c0_24 = arith.constant 0 : index
    %60 = vector.load %arg5[%c1_23, %c0_24] : memref<2x32xf32, #tpu.memory_space<vmem>>, vector<1x32xf32>
    tpu.vector_store %arg5[%c1_23, %c0_24], %14 {strides = array<i32>} : memref<2x32xf32, #tpu.memory_space<vmem>>, vector<1x32xf32>,
    return
  }
  func.func @transform_0(%arg0: i32, %arg1: memref<4xf32, #tpu.memory_space<smem>>) -> (i32, i32) {
    %c0_i32 = arith.constant 0 : i32
    %c0_i32_0 = arith.constant 0 : i32
    %c0_i32_1 = arith.constant 0 : i32
    return %c0_i32, %c0_i32_0 : i32, i32
  }
  func.func @transform_1(%arg0: i32, %arg1: memref<4xf32, #tpu.memory_space<smem>>) -> (i32, i32) {
    %c0_i32 = arith.constant 0 : i32
    %c0_i32_0 = arith.constant 0 : i32
    %c0_i32_1 = arith.constant 0 : i32
    return %c0_i32, %c0_i32_0 : i32, i32
  }
  func.func @transform_2(%arg0: i32, %arg1: memref<4xf32, #tpu.memory_space<smem>>) -> (i32, i32) {
    %c0_i32 = arith.constant 0 : i32
    %c0_i32_0 = arith.constant 0 : i32
    %c0_i32_1 = arith.constant 0 : i32
    return %c0_i32, %c0_i32_0 : i32, i32
  }
  func.func @transform_3(%arg0: i32, %arg1: memref<4xf32, #tpu.memory_space<smem>>) -> (i32, i32) {
    %c0_i32 = arith.constant 0 : i32
    %c0_i32_0 = arith.constant 0 : i32
    %c0_i32_1 = arith.constant 0 : i32
    return %c0_i32, %c0_i32_0 : i32, i32
  }
}

</mosaic_0001>

<bundles_post_ra>
// kernel: tpu_custom_call.1
= control target key start
LH: loop header
LB: loop body
LE: loop exit
PB: predicated region body
PF: predicated region fallthrough
CT: control target
= control target key end

     0   :  { %s363_s18 = smov [#allocation3]   ;;  %s425_s0 = inlined_call_operand.hbm [shape: f32[4], index: 0, kind: input, shape index: {}]   ;;  %s426_s1 = inlined_call_operand.hbm [shape: f32[8,32], index: 1, kind: input, shape index: {}]   ;;  %s427_s2 = inlined_call_operand.hbm [shape: f32[2,32], index: 2, kind: input, shape index: {}]   ;;  %s428_s3 = inlined_call_operand.hbm [shape: f32[8,32], index: 3, kind: output, shape index: {0}]   ;;  %s429_s4 = inlined_call_operand.hbm [shape: f32[2,32], index: 4, kind: output, shape index: {1}]  }
   0x1   :  { %s11_s17 = sshll.u32 %s425_s0, 4  ;;  %s12_s17 = int_to_ptr.hbm [resolvable:$true] %s11_s17 }
   0x2   :  { %14 = dma.hbm_to_smem %s12_s17, 16, %s363_s18, [#allocation2] }
   0x3   :  { %353 = dma.done.wait [#allocation2], 16 }
   0x4   :  { %354 = vsyncadd [#allocation2], 4294967280 }
   0x5   :  { %17 = sfence }
   0x6   :  { %18 = vsyncpa [#allocation5], 0 }
   0x7   :  { %19 = vsyncpa [#allocation8], 0 }
   0x8   :  { %20 = vsyncpa [#allocation6], 0 }
   0x9   :  { %21 = vsyncpa [#allocation11], 0  ;;  %s27_s21 = sshll.u32 %s426_s1, 4  ;;  %s364_s22 = smov [#allocation4]   ;;  %s28_s21 = int_to_ptr.hbm [resolvable:$true] %s27_s21 }
   0xa   :  { %s29_s23 = sshll.u32 %s364_s22, 4  ;;  %s38_s25 = sshll.u32 %s427_s2, 4  ;;  %s30_s23 = int_to_ptr.vmem [resolvable:$true] %s29_s23  ;;  %s39_s25 = int_to_ptr.hbm [resolvable:$true] %s38_s25 }
   0xb   :  { %32 = dma.hbm_to_vmem [thread:$0]  %s28_s21, 128, %s30_s23, [#allocation5]  }
   0xc   :  { %s365_s26 = smov [#allocation7]  }
   0xd   :  { %s40_s27 = sshll.u32 %s365_s26, 4  ;;  %s41_s27 = int_to_ptr.vmem [resolvable:$true] %s40_s27 }
   0xe   :  { %43 = dma.hbm_to_vmem [thread:$0]  %s39_s25, 32, %s41_s27, [#allocation8]  }
   0xf   :  { %355 = dma.done.wait [#allocation5], 128  }
  0x10   :  { %356 = vsyncadd [#allocation5], 4294967168 }
  0x11   :  { %357 = dma.done.wait [#allocation8], 32  }
  0x12   :  { %358 = vsyncadd [#allocation8], 4294967264  ;;  %vm118_vm0 = vcmask 261120   ;;  %vm54_vm1 = vcmask 64512   ;;  %v407_v0 = vld [vmem:[#allocation4] sm:$0xff]  ;;  %v366_v3 = vmov 1.0  }
  0x13   :  { %73 = vmatpush.msra.mxu0 %v407_v0  ;;  %v53_v1 = vmul.f32 %v407_v0, %v407_v0  ;;  %v119_v2 = vsel %vm118_vm0, %v407_v0, 0.0  ;;  %v367_v5 = vmov 32.0   ;;  %v368_v8 = vmov 8.0   ;;  %s222_s1 = sld [smem:[#allocation3 + $0x3]]  ;;  %s371_s28 = smov [#allocation10]  }
  0x14   :  { %218 = vmatmul.msk.f32.vlgmr.msra.gmra.mxu0 %vm54_vm1, %v366_v3  ;;  %120 = vadd.xlane.f32.xlu0 %v119_v2  ;;  %235 = vrcp.f32 %v367_v5  ;;  %v369_v11 = vmov 31.0   ;;  %v370_v13 = vmov 7.0   ;;  %vm181_vm4 = vcmask 253952   ;;  %s221_s2 = sld [smem:[#allocation3 + $0x2]]  ;;  %s200_s29 = sshll.u32 %s371_s28, 4  ;;  %s201_s29 = int_to_ptr.vmem [resolvable:$true] %s200_s29 }
  0x15   :  { %93 = vmatpush.msra.mxu1 %v53_v1  ;;  %v122_v4 = vsel %vm118_vm0, %v53_v1, 0.0  ;;  %237 = vrcp.f32 %v368_v8  ;;  %s202_s6 = sshll.u32 %s429_s4, 4  ;;  %s220_s7 = sld [smem:[#allocation3 + $0x1]]  ;;  %s203_s6 = int_to_ptr.hbm [resolvable:$true] %s202_s6 }
  0x16   :  { %219 = vmatmul.msk.f32.vlgmr.msra.gmra.mxu1 %vm54_vm1, %v366_v3  ;;  %239 = vrcp.f32 %v369_v11  ;;  %s145_s8 = sld [smem:[#allocation3]]  ;;  %s372_s4 = smov [#allocation9]  }
  0x17   :  { %241 = vrcp.f32 %v370_v13  ;;  %s189_s9 = sshll.u32 %s372_s4, 4  ;;  %s191_s12 = sshll.u32 %s428_s3, 4  ;;  %s190_s9 = int_to_ptr.vmem [resolvable:$true] %s189_s9  ;;  %s192_s12 = int_to_ptr.hbm [resolvable:$true] %s191_s12 }
  0x19   :  { %v157_v47 = vstv %s222_s1 }
  0x1a   :  { %v236_v6 = vpop.eup %235  ;;  %v154_v50 = vstv %s221_s2 }
  0x1b   :  { %v126_v7 = vmul.f32 32.0, %v236_v6  ;;  %v238_v10 = vpop.eup %237  ;;  %vm130_vm2 = vweird.f32 %v236_v6  ;;  %v149_v56 = vstv %s220_s7 }
  0x1c   :  { %123 = vadd.xlane.f32.xlu0 %v122_v4  ;;  %v99_v14 = vmul.f32 8.0, %v238_v10  ;;  %v240_v16 = vpop.eup %239  ;;  %vm103_vm3 = vweird.f32 %v238_v10  ;;  %v146_v59 = vstv %s145_s8 }
  0x1d   :  { %v127_v9 = vsub.f32 1.0, %v126_v7  ;;  %v242_v18 = vpop.eup %241  ;;  %v137_v20 = vmul.f32 31.0, %v240_v16  ;;  %vm141_vm5 = vweird.f32 %v240_v16 }
  0x1e   :  { %v100_v17 = vsub.f32 1.0, %v99_v14  ;;  %v110_v23 = vmul.f32 7.0, %v242_v18  ;;  %vm114_vm6 = vweird.f32 %v242_v18 }
  0x1f   :  { %v128_v12 = vmul.f32 %v236_v6, %v127_v9  ;;  %v138_v25 = vsub.f32 1.0, %v137_v20  ;;  %v234_v9 = vld [vmem:[#allocation7 + $0x1] ss:$0 sm:$0xff] }
  0x20   :  { %v101_v22 = vmul.f32 %v238_v10, %v100_v17  ;;  %v111_v27 = vsub.f32 1.0, %v110_v23 }
  0x21   :  { %v129_v15 = vadd.f32 %v236_v6, %v128_v12  ;;  %v139_v29 = vmul.f32 %v240_v16, %v138_v25 }
  0x22   :  { %v102_v26 = vadd.f32 %v238_v10, %v101_v22  ;;  %v112_v31 = vmul.f32 %v242_v18, %v111_v27 }
  0x23   :  { %v131_v19 = vsel %vm130_vm2, %v236_v6, %v129_v15  ;;  %v140_v34 = vadd.f32 %v240_v16, %v139_v29  ;;  %v233_v6 = vld [vmem:[#allocation7] ss:$0 sm:$0xff] }
  0x24   :  { %v104_v30 = vsel %vm103_vm3, %v238_v10, %v102_v26  ;;  %v113_v37 = vadd.f32 %v242_v18, %v112_v31 }
  0x25   :  { %v142_v40 = vsel %vm141_vm5, %v240_v16, %v140_v34 }
  0x26   :  { %v115_v43 = vsel %vm114_vm6, %v242_v18, %v113_v37 }
  0x87   :  { %v121_v21 = vpop.xlane.xlu0 %120 }
  0x88   :  { %v132_v24 = vmul.f32 %v131_v19, %v121_v21 }
  0x8a   :  { %v133_v28 = vmul.f32 32.0, %v132_v24  ;;  %v147_v63 = vmul.f32 %v146_v59, %v132_v24 }
  0x8c   :  { %v134_v32 = vmul.f32 %v133_v28, %v132_v24 }
  0x8f   :  { %v124_v35 = vpop.xlane.xlu0 %123 }
  0x90   :  { %v135_v38 = vsub.f32 %v124_v35, %v134_v32 }
  0x91   :  { %v75_v33 = vpop.f32.mrf.mxu0 }
  0x92   :  { %v105_v36 = vmul.f32 %v104_v30, %v75_v33  ;;  %v143_v44 = vmul.f32 %v142_v40, %v135_v38 }
  0x93   :  { %v95_v41 = vpop.f32.mrf.mxu1 }
  0x94   :  { %v106_v39 = vmul.f32 8.0, %v105_v36  ;;  %182 = vst.msk [vmem:[#allocation10] sm:$0x1] %vm181_vm4, %v105_v36  ;;  %v144_v48 = vmax.f32 %v143_v44, 0.0  ;;  %v150_v57 = vmul.f32 %v149_v56, %v105_v36 }
  0x96   :  { %v107_v42 = vmul.f32 %v106_v39, %v105_v36  ;;  %v155_v52 = vmul.f32 %v154_v50, %v144_v48  ;;  %v151_v61 = vperm.slane %v150_v57, 0 }
  0x98   :  { %v108_v45 = vsub.f32 %v95_v41, %v107_v42  ;;  %v152_v2 = vadd.f32 %v151_v61, %v147_v63 }
  0x9a   :  { %v116_v46 = vmul.f32 %v115_v43, %v108_v45  ;;  %v161_v5 = vsub.f32 %v407_v0, %v152_v2 }
  0x9c   :  { %v117_v49 = vmax.f32 %v116_v46, 0.0 }
  0x9e   :  { %v158_v51 = vmul.f32 %v157_v47, %v117_v49  ;;  %183 = vst.msk [vmem:[#allocation10 + $0x1] sm:$0x1] %vm181_vm4, %v117_v49 }
  0x9f   :  { %205 = dma.vmem_to_hbm [thread:$0]  %s201_s29, 32, %s203_s6, [#allocation11]  }
  0xa0   :  { %v159_v53 = vperm.slane %v158_v51, 0 }
  0xa2   :  { %v160_v54 = vadd.f32 %v159_v53, %v155_v52 }
  0xa4   :  { %v162_v55 = vadd.f32 1e-05, %v160_v54 }
  0xa6   :  { %243 = vrsqrt.f32 %v162_v55  ;;  %vm169_vm8 = vweird.f32 %v162_v55 }
  0xac   :  { %v244_v58 = vpop.eup %243 }
  0xad   :  { %v164_v60 = vmul.f32 %v244_v58, %v162_v55  ;;  %vm170_vm7 = vweird.f32 %v244_v58 }
  0xae   :  { %vm171_vm9 = vmor %vm169_vm8, %vm170_vm7 }
  0xaf   :  { %v165_v62 = vmul.f32 %v244_v58, %v164_v60 }
  0xb1   :  { %v166_v1 = vmul.f32 0.5, %v165_v62 }
  0xb3   :  { %v167_v3 = vsub.f32 1.5, %v166_v1 }
  0xb5   :  { %v168_v4 = vmul.f32 %v244_v58, %v167_v3 }
  0xb7   :  { %v172_v7 = vsel %vm171_vm9, %v244_v58, %v168_v4 }
  0xb8   :  { %v173_v8 = vmul.f32 %v172_v7, %v161_v5 }
  0xba   :  { %v176_v10 = vmul.f32 %v233_v6, %v173_v8 }
  0xbc   :  { %v179_v11 = vadd.f32 %v234_v9, %v176_v10 }
  0xbe   :  { %180 = vst.msk [vmem:[#allocation9] sm:$0xff] %vm118_vm0, %v179_v11 }
  0xbf   :  { %194 = dma.vmem_to_hbm [thread:$0]  %s190_s9, 128, %s192_s12, [#allocation6]  }
  0xc0   :  { %359 = dma.done.wait [#allocation6], 128  }
  0xc1   :  { %360 = vsyncadd [#allocation6], 4294967168 }
  0xc2   :  { %361 = dma.done.wait [#allocation11], 32  }
  0xc3   :  { %362 = vsyncadd [#allocation11], 4294967264 }
  0xc4   :  { %214 = vsyncpa [#allocation5], 1 }
  0xc5   :  { %215 = vsyncpa [#allocation8], 1 }
  0xc6   :  { %216 = vsyncpa [#allocation6], 1 }
  0xc7   :  { %217 = vsyncpa [#allocation11], 1 }

</bundles_post_ra>
